<compile_context>
chip_gen: v7x
topology: tpu7x:2x2x1
jax: 0.10.0
libtpu: 0.0.40
codegen_flags: <defaults>
</compile_context>

<pallas_src>
import jax
import jax.numpy as jnp
from jax.experimental import pallas as pl
from jax.experimental.pallas import tpu as pltpu

DIMS = [36, 144, 288, 288, 144, 36]   # network sizes from the PyTorch module
DEFAULT_BATCH_TILE = 1024             # rows of the batch processed per grid step


def _round_up(x, m):
    return ((x + m - 1) // m) * m


def ddqn_kernel(x_ref,
                w1_ref, b1_ref,
                w2_ref, b2_ref,
                w3_ref, b3_ref,
                w4_ref, b4_ref,
                w5_ref, b5_ref,
                o_ref):
    # Whole MLP fused: 5 bf16 MXU matmuls with f32 accumulation, VPU bias/ReLU,
    # EUP tanh, everything resident in VMEM.
    x = x_ref[...].astype(jnp.bfloat16)

    h = jnp.dot(x, w1_ref[...], preferred_element_type=jnp.float32)
    h = jnp.maximum(h + b1_ref[...], 0.0)

    h = jnp.dot(h.astype(jnp.bfloat16), w2_ref[...], preferred_element_type=jnp.float32)
    h = jnp.maximum(h + b2_ref[...], 0.0)

    h = jnp.dot(h.astype(jnp.bfloat16), w3_ref[...], preferred_element_type=jnp.float32)
    h = jnp.maximum(h + b3_ref[...], 0.0)

    h = jnp.dot(h.astype(jnp.bfloat16), w4_ref[...], preferred_element_type=jnp.float32)
    h = jnp.maximum(h + b4_ref[...], 0.0)

    h = jnp.dot(h.astype(jnp.bfloat16), w5_ref[...], preferred_element_type=jnp.float32)
    o_ref[...] = jnp.tanh(h + b5_ref[...]).astype(o_ref.dtype)


def _prepare_params(params):
    """Cast weights to bf16, keep biases f32 as (1, out). No padding needed:
    full-array weight/bias blocks are legal BlockSpecs and the MXU pads K/N."""
    prepped = []
    for (w, b) in params:
        w = jnp.asarray(w, jnp.float32).astype(jnp.bfloat16)
        b = jnp.asarray(b, jnp.float32).reshape(1, -1)
        prepped.append((w, b))
    return prepped


def ddqn_forward(state, params, batch_tile=DEFAULT_BATCH_TILE):
    """state: (B, 36) float32, any B. params: list of 5 (W:(in,out), b:(1,out)) f32 pairs."""
    B, d_in = state.shape
    assert d_in == DIMS[0]

    prepped = _prepare_params(params)

    # Batch tile: big enough to fill MXU rows and amortize the ~0.35us/step
    # overhead, capped at ceil(B/2) (rounded to the 8-row sublane granularity)
    # so large batches give >=2 grid steps for the v7x 2-TC megacore split.
    half = _round_up((B + 1) // 2, 8)
    bt = max(8, min(batch_tile, half))
    grid = pl.cdiv(B, bt)              # partial last block; no batch padding

    in_specs = [pl.BlockSpec((bt, DIMS[0]), lambda i: (i, 0))]
    flat_params = []
    for (w, b) in prepped:
        # Grid-invariant index maps -> parameters stay resident across grid steps.
        in_specs.append(pl.BlockSpec(w.shape, lambda i: (0, 0)))
        in_specs.append(pl.BlockSpec(b.shape, lambda i: (0, 0)))
        flat_params.extend([w, b])

    out = pl.pallas_call(
        ddqn_kernel,
        out_shape=jax.ShapeDtypeStruct((B, DIMS[-1]), jnp.float32),
        grid_spec=pl.GridSpec(
            grid=(grid,),
            in_specs=in_specs,
            out_specs=pl.BlockSpec((bt, DIMS[-1]), lambda i: (i, 0)),
        ),
        compiler_params=pltpu.CompilerParams(
            dimension_semantics=("parallel",),      # shard batch steps across TCs (v7x megacore)
            vmem_limit_bytes=32 * 1024 * 1024,      # headroom for bt up to ~2048 (safe on v5e/v6e/v7x)
        ),
    )(jnp.asarray(state, jnp.float32), *flat_params)

    return out                                       # already (B, 36) f32 — no slice pass


def init_params(key):
    """Deterministic PyTorch-Linear-style init: U(-1/sqrt(fan_in), 1/sqrt(fan_in))."""
    params = []
    for i in range(len(DIMS) - 1):
        fan_in, fan_out = DIMS[i], DIMS[i + 1]
        key, kw, kb = jax.random.split(key, 3)
        bound = 1.0 / jnp.sqrt(jnp.float32(fan_in))
        w = jax.random.uniform(kw, (fan_in, fan_out), jnp.float32, -bound, bound)
        b = jax.random.uniform(kb, (1, fan_out), jnp.float32, -bound, bound)
        params.append((w, b))
    return params


def ddqn_ref_f32(state, params):
    """Pure-JAX f32 reference (exact PyTorch forward semantics)."""
    h = state
    for i, (w, b) in enumerate(params):
        h = h @ w + b
        if i < len(params) - 1:
            h = jnp.maximum(h, 0.0)
    return jnp.tanh(h)


def ddqn_ref_bf16(state, params):
    """Reference mirroring the kernel's precision (bf16 operands, f32 accumulation)."""
    h = state
    for i, (w, b) in enumerate(params):
        h = jnp.dot(h.astype(jnp.bfloat16), w.astype(jnp.bfloat16),
                    preferred_element_type=jnp.float32) + jnp.asarray(b, jnp.float32)
        if i < len(params) - 1:
            h = jnp.maximum(h, 0.0)
    return jnp.tanh(h)


if __name__ == "__main__":
    params = init_params(jax.random.PRNGKey(0))
    key = jax.random.PRNGKey(0)
    key, k1, k2 = jax.random.split(key, 3)

    fwd = jax.jit(ddqn_forward, static_argnames=("batch_tile",))

    # Small demo batch.
    B = 8
    state = jax.random.normal(k1, (B, DIMS[0]), jnp.float32)
    out = jax.block_until_ready(fwd(state, params))
    assert out.shape == (B, DIMS[-1])
    # bf16 weights -> loose tolerance vs f32 ref; tight vs the bf16-precision ref.
    assert jnp.allclose(out, ddqn_ref_bf16(state, params), atol=2e-2, rtol=2e-2), \
        "mismatch vs bf16 reference"
    assert jnp.allclose(out, ddqn_ref_f32(state, params), atol=5e-2, rtol=5e-2), \
        "mismatch vs f32 reference"

    # Irregular batch exercises the cdiv grid / partial-last-block path
    # (13 rows, tile 8 -> 2 grid steps, second block partial, no wrapper padding).
    B2 = 13
    state2 = jax.random.normal(k2, (B2, DIMS[0]), jnp.float32)
    out2 = jax.block_until_ready(fwd(state2, params))
    assert out2.shape == (B2, DIMS[-1])
    assert jnp.allclose(out2, ddqn_ref_bf16(state2, params), atol=2e-2, rtol=2e-2), \
        "mismatch vs bf16 reference (partial block path)"

    print("KERNEL_OK")
</pallas_src>

<mosaic_0001>
module attributes {stable_mosaic.version = 11 : i64} {
  func.func @ddqn_kernel(%arg0: i32, %arg1: memref<8x36xf32, #tpu.memory_space<vmem>>, %arg2: memref<36x144xbf16, #tpu.memory_space<vmem>>, %arg3: memref<1x144xf32, #tpu.memory_space<vmem>>, %arg4: memref<144x288xbf16, #tpu.memory_space<vmem>>, %arg5: memref<1x288xf32, #tpu.memory_space<vmem>>, %arg6: memref<288x288xbf16, #tpu.memory_space<vmem>>, %arg7: memref<1x288xf32, #tpu.memory_space<vmem>>, %arg8: memref<288x144xbf16, #tpu.memory_space<vmem>>, %arg9: memref<1x144xf32, #tpu.memory_space<vmem>>, %arg10: memref<144x36xbf16, #tpu.memory_space<vmem>>, %arg11: memref<1x36xf32, #tpu.memory_space<vmem>>, %arg12: memref<8x36xf32, #tpu.memory_space<vmem>>) attributes {dimension_semantics = [#tpu.dimension_semantics<parallel>], iteration_bounds = array<i64: 1>, scalar_prefetch = 0 : i64, scratch_operands = 0 : i64, tpu.core_type = #tpu.core_type<tc>, window_params = [{transform_indices = @transform_0, window_bounds = array<i64: 8, 36>}, {pipeline_mode = #tpu.pipeline_mode<synchronous>, transform_indices = @transform_1, window_bounds = array<i64: 36, 144>}, {pipeline_mode = #tpu.pipeline_mode<synchronous>, transform_indices = @transform_2, window_bounds = array<i64: 1, 144>}, {pipeline_mode = #tpu.pipeline_mode<synchronous>, transform_indices = @transform_3, window_bounds = array<i64: 144, 288>}, {pipeline_mode = #tpu.pipeline_mode<synchronous>, transform_indices = @transform_4, window_bounds = array<i64: 1, 288>}, {pipeline_mode = #tpu.pipeline_mode<synchronous>, transform_indices = @transform_5, window_bounds = array<i64: 288, 288>}, {pipeline_mode = #tpu.pipeline_mode<synchronous>, transform_indices = @transform_6, window_bounds = array<i64: 1, 288>}, {pipeline_mode = #tpu.pipeline_mode<synchronous>, transform_indices = @transform_7, window_bounds = array<i64: 288, 144>}, {pipeline_mode = #tpu.pipeline_mode<synchronous>, transform_indices = @transform_8, window_bounds = array<i64: 1, 144>}, {pipeline_mode = #tpu.pipeline_mode<synchronous>, transform_indices = @transform_9, window_bounds = array<i64: 144, 36>}, {pipeline_mode = #tpu.pipeline_mode<synchronous>, transform_indices = @transform_10, window_bounds = array<i64: 1, 36>}, {transform_indices = @transform_11, window_bounds = array<i64: 8, 36>}]} {
    %c0 = arith.constant 0 : index
    %c0_0 = arith.constant 0 : index
    %0 = vector.load %arg1[%c0, %c0_0] : memref<8x36xf32, #tpu.memory_space<vmem>>, vector<8x36xf32>
    %1 = arith.truncf %0 : vector<8x36xf32> to vector<8x36xbf16>
    %c0_1 = arith.constant 0 : index
    %c0_2 = arith.constant 0 : index
    %2 = vector.load %arg2[%c0_1, %c0_2] : memref<36x144xbf16, #tpu.memory_space<vmem>>, vector<36x144xbf16>
    %cst = arith.constant dense<0.000000e+00> : vector<8x144xf32>
    %3 = tpu.matmul %1, %2, %cst {dimension_numbers = #tpu.dot_dimension_numbers<[1], [0], [0], [1], [0, 0, 1, 1], [], []>} : vector<8x36xbf16>, vector<36x144xbf16>, vector<8x144xf32> -> vector<8x144xf32>
    %c0_3 = arith.constant 0 : index
    %c0_4 = arith.constant 0 : index
    %4 = vector.load %arg3[%c0_3, %c0_4] : memref<1x144xf32, #tpu.memory_space<vmem>>, vector<1x144xf32>
    %5 = vector.broadcast %4 : vector<1x144xf32> to vector<8x144xf32>
    %6 = arith.addf %3, %5 : vector<8x144xf32>
    %cst_5 = arith.constant 0.000000e+00 : f32
    %7 = vector.broadcast %cst_5 : f32 to vector<8x144xf32>
    %8 = arith.maximumf %6, %7 : vector<8x144xf32>
    %9 = arith.truncf %8 : vector<8x144xf32> to vector<8x144xbf16>
    %c0_6 = arith.constant 0 : index
    %c0_7 = arith.constant 0 : index
    %10 = vector.load %arg4[%c0_6, %c0_7] : memref<144x288xbf16, #tpu.memory_space<vmem>>, vector<144x288xbf16>
    %cst_8 = arith.constant dense<0.000000e+00> : vector<8x288xf32>
    %11 = tpu.matmul %9, %10, %cst_8 {dimension_numbers = #tpu.dot_dimension_numbers<[1], [0], [0], [1], [0, 0, 1, 1], [], []>} : vector<8x144xbf16>, vector<144x288xbf16>, vector<8x288xf32> -> vector<8x288xf32>
    %c0_9 = arith.constant 0 : index
    %c0_10 = arith.constant 0 : index
    %12 = vector.load %arg5[%c0_9, %c0_10] : memref<1x288xf32, #tpu.memory_space<vmem>>, vector<1x288xf32>
    %13 = vector.broadcast %12 : vector<1x288xf32> to vector<8x288xf32>
    %14 = arith.addf %11, %13 : vector<8x288xf32>
    %cst_11 = arith.constant 0.000000e+00 : f32
    %15 = vector.broadcast %cst_11 : f32 to vector<8x288xf32>
    %16 = arith.maximumf %14, %15 : vector<8x288xf32>
    %17 = arith.truncf %16 : vector<8x288xf32> to vector<8x288xbf16>
    %c0_12 = arith.constant 0 : index
    %c0_13 = arith.constant 0 : index
    %18 = vector.load %arg6[%c0_12, %c0_13] : memref<288x288xbf16, #tpu.memory_space<vmem>>, vector<288x288xbf16>
    %cst_14 = arith.constant dense<0.000000e+00> : vector<8x288xf32>
    %19 = tpu.matmul %17, %18, %cst_14 {dimension_numbers = #tpu.dot_dimension_numbers<[1], [0], [0], [1], [0, 0, 1, 1], [], []>} : vector<8x288xbf16>, vector<288x288xbf16>, vector<8x288xf32> -> vector<8x288xf32>
    %c0_15 = arith.constant 0 : index
    %c0_16 = arith.constant 0 : index
    %20 = vector.load %arg7[%c0_15, %c0_16] : memref<1x288xf32, #tpu.memory_space<vmem>>, vector<1x288xf32>
    %21 = vector.broadcast %20 : vector<1x288xf32> to vector<8x288xf32>
    %22 = arith.addf %19, %21 : vector<8x288xf32>
    %cst_17 = arith.constant 0.000000e+00 : f32
    %23 = vector.broadcast %cst_17 : f32 to vector<8x288xf32>
    %24 = arith.maximumf %22, %23 : vector<8x288xf32>
    %25 = arith.truncf %24 : vector<8x288xf32> to vector<8x288xbf16>
    %c0_18 = arith.constant 0 : index
    %c0_19 = arith.constant 0 : index
    %26 = vector.load %arg8[%c0_18, %c0_19] : memref<288x144xbf16, #tpu.memory_space<vmem>>, vector<288x144xbf16>
    %cst_20 = arith.constant dense<0.000000e+00> : vector<8x144xf32>
    %27 = tpu.matmul %25, %26, %cst_20 {dimension_numbers = #tpu.dot_dimension_numbers<[1], [0], [0], [1], [0, 0, 1, 1], [], []>} : vector<8x288xbf16>, vector<288x144xbf16>, vector<8x144xf32> -> vector<8x144xf32>
    %c0_21 = arith.constant 0 : index
    %c0_22 = arith.constant 0 : index
    %28 = vector.load %arg9[%c0_21, %c0_22] : memref<1x144xf32, #tpu.memory_space<vmem>>, vector<1x144xf32>
    %29 = vector.broadcast %28 : vector<1x144xf32> to vector<8x144xf32>
    %30 = arith.addf %27, %29 : vector<8x144xf32>
    %cst_23 = arith.constant 0.000000e+00 : f32
    %31 = vector.broadcast %cst_23 : f32 to vector<8x144xf32>
    %32 = arith.maximumf %30, %31 : vector<8x144xf32>
    %33 = arith.truncf %32 : vector<8x144xf32> to vector<8x144xbf16>
    %c0_24 = arith.constant 0 : index
    %c0_25 = arith.constant 0 : index
    %34 = vector.load %arg10[%c0_24, %c0_25] : memref<144x36xbf16, #tpu.memory_space<vmem>>, vector<144x36xbf16>
    %cst_26 = arith.constant dense<0.000000e+00> : vector<8x36xf32>
    %35 = tpu.matmul %33, %34, %cst_26 {dimension_numbers = #tpu.dot_dimension_numbers<[1], [0], [0], [1], [0, 0, 1, 1], [], []>} : vector<8x144xbf16>, vector<144x36xbf16>, vector<8x36xf32> -> vector<8x36xf32>
    %c0_27 = arith.constant 0 : index
    %c0_28 = arith.constant 0 : index
    %36 = vector.load %arg11[%c0_27, %c0_28] : memref<1x36xf32, #tpu.memory_space<vmem>>, vector<1x36xf32>
    %37 = vector.broadcast %36 : vector<1x36xf32> to vector<8x36xf32>
    %38 = arith.addf %35, %37 : vector<8x36xf32>
    %39 = math.tanh %38 : vector<8x36xf32>
    %c0_29 = arith.constant 0 : index
    %c0_30 = arith.constant 0 : index
    %40 = vector.load %arg12[%c0_29, %c0_30] : memref<8x36xf32, #tpu.memory_space<vmem>>, vector<8x36xf32>
    tpu.vector_store %arg12[%c0_29, %c0_30], %39 {strides = array<i32>} : memref<8x36xf32, #tpu.memory_space<vmem>>, vector<8x36xf32>,
    return
  }
  func.func @transform_0(%arg0: i32) -> (i32, i32) {
    %c0_i32 = arith.constant 0 : i32
    %c0_i32_0 = arith.constant 0 : i32
    return %arg0, %c0_i32 : i32, i32
  }
  func.func @transform_1(%arg0: i32) -> (i32, i32) {
    %c0_i32 = arith.constant 0 : i32
    %c0_i32_0 = arith.constant 0 : i32
    %c0_i32_1 = arith.constant 0 : i32
    return %c0_i32, %c0_i32_0 : i32, i32
  }
  func.func @transform_2(%arg0: i32) -> (i32, i32) {
    %c0_i32 = arith.constant 0 : i32
    %c0_i32_0 = arith.constant 0 : i32
    %c0_i32_1 = arith.constant 0 : i32
    return %c0_i32, %c0_i32_0 : i32, i32
  }
  func.func @transform_3(%arg0: i32) -> (i32, i32) {
    %c0_i32 = arith.constant 0 : i32
    %c0_i32_0 = arith.constant 0 : i32
    %c0_i32_1 = arith.constant 0 : i32
    return %c0_i32, %c0_i32_0 : i32, i32
  }
  func.func @transform_4(%arg0: i32) -> (i32, i32) {
    %c0_i32 = arith.constant 0 : i32
    %c0_i32_0 = arith.constant 0 : i32
    %c0_i32_1 = arith.constant 0 : i32
    return %c0_i32, %c0_i32_0 : i32, i32
  }
  func.func @transform_5(%arg0: i32) -> (i32, i32) {
    %c0_i32 = arith.constant 0 : i32
    %c0_i32_0 = arith.constant 0 : i32
    %c0_i32_1 = arith.constant 0 : i32
    return %c0_i32, %c0_i32_0 : i32, i32
  }
  func.func @transform_6(%arg0: i32) -> (i32, i32) {
    %c0_i32 = arith.constant 0 : i32
    %c0_i32_0 = arith.constant 0 : i32
    %c0_i32_1 = arith.constant 0 : i32
    return %c0_i32, %c0_i32_0 : i32, i32
  }
  func.func @transform_7(%arg0: i32) -> (i32, i32) {
    %c0_i32 = arith.constant 0 : i32
    %c0_i32_0 = arith.constant 0 : i32
    %c0_i32_1 = arith.constant 0 : i32
    return %c0_i32, %c0_i32_0 : i32, i32
  }
  func.func @transform_8(%arg0: i32) -> (i32, i32) {
    %c0_i32 = arith.constant 0 : i32
    %c0_i32_0 = arith.constant 0 : i32
    %c0_i32_1 = arith.constant 0 : i32
    return %c0_i32, %c0_i32_0 : i32, i32
  }
  func.func @transform_9(%arg0: i32) -> (i32, i32) {
    %c0_i32 = arith.constant 0 : i32
    %c0_i32_0 = arith.constant 0 : i32
    %c0_i32_1 = arith.constant 0 : i32
    return %c0_i32, %c0_i32_0 : i32, i32
  }
  func.func @transform_10(%arg0: i32) -> (i32, i32) {
    %c0_i32 = arith.constant 0 : i32
    %c0_i32_0 = arith.constant 0 : i32
    %c0_i32_1 = arith.constant 0 : i32
    return %c0_i32, %c0_i32_0 : i32, i32
  }
  func.func @transform_11(%arg0: i32) -> (i32, i32) {
    %c0_i32 = arith.constant 0 : i32
    %c0_i32_0 = arith.constant 0 : i32
    return %arg0, %c0_i32 : i32, i32
  }
}

</mosaic_0001>

<bundles_post_ra>
// kernel: ddqn_forward.1
= control target key start
LH: loop header
LB: loop body
LE: loop exit
PB: predicated region body
PF: predicated region fallthrough
CT: control target
= control target key end

     0   :  { %v1827_v2 = vmov 0   ;;  %vm88_vm0 = vcmask 1041408   ;;  %vm84_vm1 = vcmask 293888   ;;  %s2364_s0 = inlined_call_operand.vmem [shape: f32[8,36], index: 0, kind: input, shape index: {}]   ;;  %s2365_s1 = inlined_call_operand.vmem [shape: bf16[36,144], index: 1, kind: input, shape index: {}]   ;;  %s2366_s2 = inlined_call_operand.vmem [shape: f32[1,144], index: 2, kind: input, shape index: {}]   ;;  %s2367_s3 = inlined_call_operand.vmem [shape: bf16[144,288], index: 3, kind: input, shape index: {}]   ;;  %s2368_s4 = inlined_call_operand.vmem [shape: f32[1,288], index: 4, kind: input, shape index: {}]   ;;  %s2369_s5 = inlined_call_operand.vmem [shape: bf16[288,288], index: 5, kind: input, shape index: {}]   ;;  %s2370_s6 = inlined_call_operand.vmem [shape: f32[1,288], index: 6, kind: input, shape index: {}]   ;;  %s2371_s7 = inlined_call_operand.vmem [shape: bf16[288,144], index: 7, kind: input, shape index: {}]   ;;  %s2372_s8 = inlined_call_operand.vmem [shape: f32[1,144], index: 8, kind: input, shape index: {}]   ;;  %s2373_s9 = inlined_call_operand.vmem [shape: bf16[144,36], index: 9, kind: input, shape index: {}]   ;;  %s2374_s10 = inlined_call_operand.vmem [shape: f32[1,36], index: 10, kind: input, shape index: {}]   ;;  %s2375_s11 = inlined_call_operand.hbm [shape: f32[8,36], index: 11, kind: output, shape index: {}]  }
   0x1   :  { %v1622_v0 = vld [vmem:[%s2365_s1 + $0x4] ss:$8 sps:$4 sm:$0xff]   ;;  %v1624_v1 = vld [vmem:[%s2365_s1] ss:$8 sps:$4 sm:$0xff]   ;;  %127 = vmatprep.mubr.bf16.mxu0 %v1827_v2  ;;  %v1625_v3 = vld [vmem:[%s2365_s1 + $0x14] ss:$8 sps:$4 sm:$0xff]  }
   0x2   :  { %95 = vmatprep.subr.bf16.mxu0 %v1622_v0  ;;  %v46_v4 = vld [vmem:[%s2365_s1 + $0x20] sm:$0x33]  ;;  %v1627_v5 = vld [vmem:[%s2365_s1 + $0x10] ss:$8 sps:$4 sm:$0xff]   ;;  %v1634_v11 = vld [vmem:[%s2367_s3 + $0x1c] ss:$12 sps:$4 sm:$0xff]  }
   0x3   :  { %96 = vmatpush1.bf16.msra.mxu0 %v1624_v1  ;;  %v1437_v6 = vcombine.high %v46_v4, %v46_v4  ;;  %v1436_v7 = vcombine.low %v46_v4, %v46_v4  ;;  %v1630_v8 = vld [vmem:[%s2367_s3 + $0x4] ss:$12 sps:$4 sm:$0xff]   ;;  %v1632_v9 = vld [vmem:[%s2367_s3] ss:$12 sps:$4 sm:$0xff]   ;;  %v1633_v16 = vld [vmem:[%s2367_s3 + $0x8] ss:$12 sps:$4 sm:$0xff]  }
   0x4   :  { %97 = vmatprep.subr.bf16.mxu0 %v1625_v3  ;;  %v40_v10 = vld [vmem:[%s2364_s0] sm:$0xff]  ;;  %341 = vmatprep.subr.bf16.mxu1 %v1630_v8  ;;  %v1640_v17 = vld [vmem:[%s2367_s3 + $0x30] ss:$12 sps:$4 sm:$0xff]   ;;  %v1642_v18 = vld [vmem:[%s2367_s3 + $0x4c] ss:$12 sps:$4 sm:$0xff]  }
   0x5   :  { %342 = vmatpush1.bf16.msra.mxu1 %v1632_v9  ;;  %v1636_v12 = vld [vmem:[%s2367_s3 + $0x18] ss:$12 sps:$4 sm:$0xff]   ;;  %v90_v13 = vsel %vm88_vm0, %v1436_v7, 0  ;;  %v1638_v14 = vld [vmem:[%s2367_s3 + $0x34] ss:$12 sps:$4 sm:$0xff]   ;;  %v41_v15 = vpack.c.bf16 %v40_v10, %v40_v10 }
   0x6   :  { %343 = vmatprep.subr.bf16.mxu1 %v1634_v11  ;;  %v1637_v19 = vld [vmem:[%s2367_s3 + $0x20] ss:$12 sps:$4 sm:$0xff]   ;;  %v1644_v20 = vld [vmem:[%s2367_s3 + $0x48] ss:$12 sps:$4 sm:$0xff]   ;;  %v1646_v21 = vld [vmem:[%s2367_s3 + $0x64] ss:$12 sps:$4 sm:$0xff]  }
   0x7   :  { %98 = vmatpush1.bf16.msra.mxu0 %v1627_v5  ;;  %v1641_v22 = vld [vmem:[%s2367_s3 + $0x38] ss:$12 sps:$4 sm:$0xff]   ;;  %v1648_v23 = vld [vmem:[%s2367_s3 + $0x60] ss:$12 sps:$4 sm:$0xff]   ;;  %v1650_v24 = vld [vmem:[%s2367_s3 + $0x7c] ss:$12 sps:$4 sm:$0xff]  }
   0x8   :  { %1438 = vmatprep.subr.msk.bf16.mxu0 %vm88_vm0, %v1437_v6  ;;  %v1645_v25 = vld [vmem:[%s2367_s3 + $0x50] ss:$12 sps:$4 sm:$0xff]   ;;  %v1652_v26 = vld [vmem:[%s2367_s3 + $0x78] ss:$12 sps:$4 sm:$0xff]   ;;  %v1654_v27 = vld [vmem:[%s2367_s3 + $0x94] ss:$12 sps:$4 sm:$0xff]  }
   0x9   :  { %344 = vmatpush1.bf16.msra.mxu1 %v1636_v12  ;;  %v1649_v28 = vld [vmem:[%s2367_s3 + $0x68] ss:$12 sps:$4 sm:$0xff]   ;;  %v1656_v29 = vld [vmem:[%s2367_s3 + $0x90] ss:$12 sps:$4 sm:$0xff]   ;;  %v1653_v30 = vld [vmem:[%s2367_s3 + $0x80] ss:$12 sps:$4 sm:$0xff]  }
   0xa   :  { %345 = vmatprep.subr.bf16.mxu1 %v1638_v14  ;;  %v1657_v31 = vld [vmem:[%s2367_s3 + $0x98] ss:$12 sps:$4 sm:$0xff]  }
   0xb   :  { %100 = vmatpush1.bf16.msra.mxu0 %v90_v13 }
   0xc   :  { %382 = vmatprep.subr.bf16.mxu0 %v1827_v2 }
   0xd   :  { %346 = vmatpush1.bf16.msra.mxu1 %v1640_v17 }
   0xe   :  { %1439 = vmatmul.mubr.msk.bf16.vlgmr.msra.gmra.mrb[0].mxu0 %vm84_vm1, %v41_v15  ;;  %347 = vmatprep.subr.bf16.mxu1 %v1642_v18 }
   0xf   :  { %383 = vmatpush1.bf16.msra.mxu0 %v1633_v16 }
  0x10   :  { %384 = vmatprep.subr.bf16.mxu0 %v1827_v2 }
  0x11   :  { %348 = vmatpush1.bf16.msra.mxu1 %v1644_v20 }
  0x12   :  { %349 = vmatprep.subr.bf16.mxu1 %v1646_v21 }
  0x13   :  { %385 = vmatpush1.bf16.msra.mxu0 %v1637_v19 }
  0x14   :  { %386 = vmatprep.subr.bf16.mxu0 %v1827_v2 }
  0x15   :  { %350 = vmatpush1.bf16.msra.mxu1 %v1648_v23 }
  0x16   :  { %351 = vmatprep.subr.bf16.mxu1 %v1650_v24 }
  0x17   :  { %387 = vmatpush1.bf16.msra.mxu0 %v1641_v22 }
  0x18   :  { %388 = vmatprep.subr.bf16.mxu0 %v1827_v2 }
  0x19   :  { %352 = vmatpush1.bf16.msra.mxu1 %v1652_v26 }
  0x1a   :  { %353 = vmatprep.subr.bf16.mxu1 %v1654_v27 }
  0x1b   :  { %389 = vmatpush1.bf16.msra.mxu0 %v1645_v25 }
  0x1c   :  { %390 = vmatprep.subr.bf16.mxu0 %v1827_v2 }
  0x1d   :  { %354 = vmatpush1.bf16.msra.mxu1 %v1656_v29 }
  0x1f   :  { %391 = vmatpush1.bf16.msra.mxu0 %v1649_v28 }
  0x20   :  { %392 = vmatprep.subr.bf16.mxu0 %v1827_v2 }
  0x23   :  { %393 = vmatpush1.bf16.msra.mxu0 %v1653_v30 }
  0x24   :  { %394 = vmatprep.subr.bf16.mxu0 %v1827_v2 }
  0x27   :  { %395 = vmatpush1.bf16.msra.mxu0 %v1657_v31 }
  0x28   :  { %396 = vmatprep.subr.bf16.mxu0 %v1827_v2 }
  0x29   :  { %16 = vsyncpa [#allocation3], 0  ;;  %v1658_v32 = vld [vmem:[%s2367_s3 + $0xac] ss:$12 sps:$4 sm:$0xff]   ;;  %v1660_v33 = vld [vmem:[%s2367_s3 + $0xa8] ss:$12 sps:$4 sm:$0xff]   ;;  %v49_v40 = vlaneseq }
  0x2a   :  { %v1661_v34 = vld [vmem:[%s2367_s3 + $0xb0] ss:$12 sps:$4 sm:$0xff]   ;;  %355 = vmatprep.subr.bf16.mxu1 %v1658_v32  ;;  %v1664_v36 = vld [vmem:[%s2367_s3 + $0xc0] ss:$12 sps:$4 sm:$0xff]   ;;  %v1665_v37 = vld [vmem:[%s2367_s3 + $0xc8] ss:$12 sps:$4 sm:$0xff]  }
  0x2b   :  { %356 = vmatpush1.bf16.msra.mxu1 %v1660_v33  ;;  %397 = vmatpush1.bf16.msra.mxu0 %v1661_v34  ;;  %v1662_v35 = vld [vmem:[%s2367_s3 + $0xc4] ss:$12 sps:$4 sm:$0xff]   ;;  %v1693_v39 = vld [vmem:[%s2369_s5 + $0xc8] ss:$12 sps:$4 sm:$0xff]   ;;  %v2007_v41 = vshrl.u32 %v49_v40, 7  ;;  %vm337_vm2 = vcmask 130048  }
  0x2c   :  { %398 = vmatprep.subr.bf16.mxu0 %v1827_v2  ;;  %357 = vmatprep.subr.bf16.mxu1 %v1662_v35  ;;  %v1668_v38 = vld [vmem:[%s2369_s5 + $0x4] ss:$12 sps:$4 sm:$0xff]   ;;  %v47_v43 = vld [vmem:[%s2366_s2] sm:$0x3]  ;;  %v1694_v57 = vld [vmem:[%s2369_s5 + $0x8] ss:$12 sps:$4 sm:$0xff]  }
  0x2d   :  { %v2010_v42 = vsub.s32 0, %v2007_v41  ;;  %v2016_v44 = vsub.s32 1, %v2007_v41  ;;  %v1666_v56 = vld [vmem:[%s2369_s5] ss:$12 sps:$4 sm:$0xff]   ;;  %v1671_v59 = vld [vmem:[%s2369_s5 + $0x1c] ss:$12 sps:$4 sm:$0xff]  }
  0x2e   :  { %v1698_v60 = vld [vmem:[%s2369_s5 + $0xe0] ss:$12 sps:$4 sm:$0xff]   ;;  %v1669_v61 = vld [vmem:[%s2369_s5 + $0x18] ss:$12 sps:$4 sm:$0xff]   ;;  %v1672_v1 = vld [vmem:[%s2369_s5 + $0x30] ss:$12 sps:$4 sm:$0xff]  }
  0x2f   :  { %358 = vmatpush1.bf16.msra.mxu1 %v1664_v36  ;;  %399 = vmatpush1.bf16.msra.mxu0 %v1665_v37  ;;  %v52_v45 = vrot.slane %v47_v43, %v2010_v42  ;;  %v56_v46 = vrot.slane %v47_v43, %v2016_v44  ;;  %v1699_v62 = vld [vmem:[%s2369_s5 + $0x20] ss:$12 sps:$4 sm:$0xff]   ;;  %v1703_v0 = vld [vmem:[%s2369_s5 + $0xf8] ss:$12 sps:$4 sm:$0xff]   ;;  %v1708_v5 = vld [vmem:[%s2369_s5 + $0x110] ss:$12 sps:$4 sm:$0xff]  }
  0x30   :  { %809 = vmatprep.subr.bf16.mxu1 %v1668_v38  ;;  %1573 = vmatprep.subr.bf16.mxu0 %v1693_v39  ;;  %v1674_v63 = vld [vmem:[%s2369_s5 + $0x34] ss:$12 sps:$4 sm:$0xff]   ;;  %v1704_v3 = vld [vmem:[%s2369_s5 + $0x38] ss:$12 sps:$4 sm:$0xff]   ;;  %v1709_v7 = vld [vmem:[%s2369_s5 + $0x50] ss:$12 sps:$4 sm:$0xff]  }
  0x31   :  { %v1677_v4 = vld [vmem:[%s2369_s5 + $0x4c] ss:$12 sps:$4 sm:$0xff]   ;;  %v1675_v6 = vld [vmem:[%s2369_s5 + $0x48] ss:$12 sps:$4 sm:$0xff]   ;;  %v1680_v8 = vld [vmem:[%s2369_s5 + $0x64] ss:$12 sps:$4 sm:$0xff]  }
  0x32   :  { %v1713_v9 = vld [vmem:[%s2369_s5 + $0x128] ss:$12 sps:$4 sm:$0xff]   ;;  %v1678_v10 = vld [vmem:[%s2369_s5 + $0x60] ss:$12 sps:$4 sm:$0xff]   ;;  %v1681_v14 = vld [vmem:[%s2369_s5 + $0x78] ss:$12 sps:$4 sm:$0xff]  }
  0x33   :  { %v1714_v11 = vld [vmem:[%s2369_s5 + $0x68] ss:$12 sps:$4 sm:$0xff]   ;;  %v1718_v13 = vld [vmem:[%s2369_s5 + $0x140] ss:$12 sps:$4 sm:$0xff]   ;;  %v1684_v17 = vld [vmem:[%s2369_s5 + $0x90] ss:$12 sps:$4 sm:$0xff]  }
  0x34   :  { %v1683_v12 = vld [vmem:[%s2369_s5 + $0x7c] ss:$12 sps:$4 sm:$0xff]   ;;  %v1719_v15 = vld [vmem:[%s2369_s5 + $0x80] ss:$12 sps:$4 sm:$0xff]   ;;  %v1692_v20 = vld [vmem:[%s2369_s5 + $0xc4] ss:$12 sps:$4 sm:$0xff]  }
  0x35   :  { %v1686_v16 = vld [vmem:[%s2369_s5 + $0x94] ss:$12 sps:$4 sm:$0xff]   ;;  %v1689_v18 = vld [vmem:[%s2369_s5 + $0xac] ss:$12 sps:$4 sm:$0xff]   ;;  %v1697_v22 = vld [vmem:[%s2369_s5 + $0xdc] ss:$12 sps:$4 sm:$0xff]  }
  0x36   :  { %v1687_v19 = vld [vmem:[%s2369_s5 + $0xa8] ss:$12 sps:$4 sm:$0xff]   ;;  %v1690_v21 = vld [vmem:[%s2369_s5 + $0xc0] ss:$12 sps:$4 sm:$0xff]   ;;  %v1695_v23 = vld [vmem:[%s2369_s5 + $0xd8] ss:$12 sps:$4 sm:$0xff]  }
  0x37   :  { %v1702_v24 = vld [vmem:[%s2369_s5 + $0xf4] ss:$12 sps:$4 sm:$0xff]   ;;  %v1700_v25 = vld [vmem:[%s2369_s5 + $0xf0] ss:$12 sps:$4 sm:$0xff]   ;;  %v1707_v26 = vld [vmem:[%s2369_s5 + $0x10c] ss:$12 sps:$4 sm:$0xff]  }
  0x38   :  { %v1705_v27 = vld [vmem:[%s2369_s5 + $0x108] ss:$12 sps:$4 sm:$0xff]   ;;  %v1712_v28 = vld [vmem:[%s2369_s5 + $0x124] ss:$12 sps:$4 sm:$0xff]   ;;  %v1710_v29 = vld [vmem:[%s2369_s5 + $0x120] ss:$12 sps:$4 sm:$0xff]  }
  0x39   :  { %v1717_v30 = vld [vmem:[%s2369_s5 + $0x13c] ss:$12 sps:$4 sm:$0xff]   ;;  %v1715_v31 = vld [vmem:[%s2369_s5 + $0x138] ss:$12 sps:$4 sm:$0xff]   ;;  %v1722_v32 = vld [vmem:[%s2369_s5 + $0x154] ss:$12 sps:$4 sm:$0xff]  }
  0x3a   :  { %v1723_v33 = vld [vmem:[%s2369_s5 + $0x158] ss:$12 sps:$4 sm:$0xff]   ;;  %v1720_v34 = vld [vmem:[%s2369_s5 + $0x150] ss:$12 sps:$4 sm:$0xff]   ;;  %v1725_v38 = vld [vmem:[%s2369_s5 + $0x168] ss:$12 sps:$4 sm:$0xff]  }
  0x3b   :  { %v1724_v35 = vld [vmem:[%s2369_s5 + $0x98] ss:$12 sps:$4 sm:$0xff]   ;;  %v1728_v37 = vld [vmem:[%s2369_s5 + $0x170] ss:$12 sps:$4 sm:$0xff]   ;;  %vm805_vm3 = vcmask 261120   ;;  %vm1829_vm4 = vmmov 0  }
  0x3c   :  { %v1727_v36 = vld [vmem:[%s2369_s5 + $0x16c] ss:$12 sps:$4 sm:$0xff]   ;;  %v1729_v39 = vld [vmem:[%s2369_s5 + $0xb0] ss:$12 sps:$4 sm:$0xff]  }
  0x3d   :  { %v1732_v40 = vld [vmem:[%s2369_s5 + $0x184] ss:$12 sps:$4 sm:$0xff]  }
  0x3e   :  { %v1740_v43 = vld [vmem:[%s2371_s7 + $0x4] ss:$8 sps:$4 sm:$0xff]  }
  0xe1   :  { %v129_v47 = vpop.f32.mrb[0].mxu0 }
  0xe2   :  { %v130_v48 = vadd.f32 %v129_v47, %v52_v45  ;;  %v131_v49 = vpop.f32.mrb[1].mxu0  ;;  %v176_v45 = vld [vmem:[%s2368_s4] sm:$0x7] }
  0xe3   :  { %v132_v50 = vadd.f32 %v131_v49, %v56_v46  ;;  %v133_v51 = vpop.f32.mrb[2].mxu0  ;;  %v181_v46 = vrot.slane %v176_v45, %v2010_v42  ;;  %v185_v47 = vrot.slane %v176_v45, %v2016_v44 }
  0xe4   :  { %v136_v52 = vmax.f32 %v130_v48, 0.0  ;;  %v134_v53 = vpop.f32.mrb[3].mxu0 }
  0xe5   :  { %v137_v54 = vmax.f32 %v132_v50, 0.0 }
  0xe6   :  { %v138_v58 = vpack.c.bf16 %v136_v52, %v136_v52 }
  0xe7   :  { %v139_v55 = vpack.c.bf16 %v137_v54, %v137_v54 }
  0xe9   :  { %1467 = vmatprep.mubr.msk.bf16.mxu1 %vm337_vm2, %v139_v55  ;;  %1468 = vmatprep.mubr.msk.bf16.mxu0 %vm337_vm2, %v139_v55 }
  0xea   :  { %374 = vmatmul.mubr.bf16.vlgmr.msra.gmra.mrb[0].mxu1 %v138_v58  ;;  %415 = vmatmul.mubr.bf16.vlgmr.msra.gmra.mrb[4].mxu0 %v138_v58 }
  0xeb   :  { %810 = vmatpush1.bf16.msra.mxu1 %v1666_v56  ;;  %1574 = vmatpush3.bf16.msra.mxu0 %v1694_v57  ;;  %v188_v57 = vsub.s32 2, %v2007_v41 }
  0xec   :  { %811 = vmatprep.subr.bf16.mxu1 %v1671_v59  ;;  %1575 = vmatprep.subr.bf16.mxu0 %v1698_v60 }
  0xef   :  { %812 = vmatpush1.bf16.msra.mxu1 %v1669_v61  ;;  %1576 = vmatpush3.bf16.msra.mxu0 %v1699_v62  ;;  %v1730_v62 = vld [vmem:[%s2369_s5 + $0x180] ss:$12 sps:$4 sm:$0xff]  }
  0xf0   :  { %813 = vmatprep.subr.bf16.mxu1 %v1674_v63  ;;  %1577 = vmatprep.subr.bf16.mxu0 %v1703_v0  ;;  %v189_v0 = vrot.slane %v176_v45, %v188_v57  ;;  %v1792_v45 = vld [vmem:[%s2373_s9] sm:$0xff]  }
  0xf3   :  { %814 = vmatpush1.bf16.msra.mxu1 %v1672_v1  ;;  %1578 = vmatpush3.bf16.msra.mxu0 %v1704_v3  ;;  %v1735_v1 = vld [vmem:[%s2369_s5 + $0x19c] ss:$12 sps:$4 sm:$0xff]  }
  0xf4   :  { %815 = vmatprep.subr.bf16.mxu1 %v1677_v4  ;;  %1579 = vmatprep.subr.bf16.mxu0 %v1708_v5  ;;  %v1738_v3 = vld [vmem:[%s2371_s7] ss:$8 sps:$4 sm:$0xff]   ;;  %v1743_v4 = vld [vmem:[%s2371_s7 + $0x14] ss:$8 sps:$4 sm:$0xff]   ;;  %v1733_v5 = vld [vmem:[%s2369_s5 + $0x198] ss:$12 sps:$4 sm:$0xff]  }
  0xf7   :  { %816 = vmatpush1.bf16.msra.mxu1 %v1675_v6  ;;  %1580 = vmatpush3.bf16.msra.mxu0 %v1709_v7  ;;  %v1741_v7 = vld [vmem:[%s2371_s7 + $0x10] ss:$8 sps:$4 sm:$0xff]  }
  0xf8   :  { %817 = vmatprep.subr.bf16.mxu1 %v1680_v8  ;;  %1581 = vmatprep.subr.bf16.mxu0 %v1713_v9  ;;  %v1746_v8 = vld [vmem:[%s2371_s7 + $0x24] ss:$8 sps:$4 sm:$0xff]  }
  0xfb   :  { %818 = vmatpush1.bf16.msra.mxu1 %v1678_v10  ;;  %1582 = vmatpush3.bf16.msra.mxu0 %v1714_v11  ;;  %v1828_v10 = vmov 0.0   ;;  %v1744_v11 = vld [vmem:[%s2371_s7 + $0x20] ss:$8 sps:$4 sm:$0xff]  }
  0xfc   :  { %819 = vmatprep.subr.bf16.mxu1 %v1683_v12  ;;  %1583 = vmatprep.subr.bf16.mxu0 %v1718_v13  ;;  %v1749_v12 = vld [vmem:[%s2371_s7 + $0x34] ss:$8 sps:$4 sm:$0xff]  }
  0xfd   :  { %v1736_v13 = vld [vmem:[%s2369_s5 + $0x188] ss:$12 sps:$4 sm:$0xff]  }
  0xff   :  { %820 = vmatpush1.bf16.msra.mxu1 %v1681_v14  ;;  %1584 = vmatpush3.bf16.msra.mxu0 %v1719_v15  ;;  %v1747_v15 = vld [vmem:[%s2371_s7 + $0x30] ss:$8 sps:$4 sm:$0xff]  }
 0x100   :  { %821 = vmatprep.subr.bf16.mxu1 %v1686_v16  ;;  %1585 = vmatprep.subr.bf16.mxu0 %v1723_v33  ;;  %v1752_v16 = vld [vmem:[%s2371_s7 + $0x44] ss:$8 sps:$4 sm:$0xff]   ;;  %v1774_v33 = vld [vmem:[%s2371_s7 + $0xc0] ss:$8 sps:$4 sm:$0xff]  }
 0x103   :  { %822 = vmatpush1.bf16.msra.mxu1 %v1684_v17  ;;  %1586 = vmatpush3.bf16.msra.mxu0 %v1724_v35  ;;  %v1737_v17 = vld [vmem:[%s2369_s5 + $0x1a0] ss:$12 sps:$4 sm:$0xff]   ;;  %v1779_v35 = vld [vmem:[%s2371_s7 + $0xd4] ss:$8 sps:$4 sm:$0xff]  }
 0x104   :  { %823 = vmatprep.subr.bf16.mxu1 %v1689_v18  ;;  %1587 = vmatprep.subr.bf16.mxu0 %v1728_v37  ;;  %v1750_v18 = vld [vmem:[%s2371_s7 + $0x40] ss:$8 sps:$4 sm:$0xff]   ;;  %v1782_v37 = vld [vmem:[%s2371_s7 + $0xe4] ss:$8 sps:$4 sm:$0xff]  }
 0x107   :  { %824 = vmatpush1.bf16.msra.mxu1 %v1687_v19  ;;  %1588 = vmatpush3.bf16.msra.mxu0 %v1729_v39  ;;  %v1755_v19 = vld [vmem:[%s2371_s7 + $0x54] ss:$8 sps:$4 sm:$0xff]  }
 0x108   :  { %825 = vmatprep.subr.bf16.mxu1 %v1692_v20  ;;  %1208 = vmatprep.subr.bf16.mxu0 %v1740_v43  ;;  %v1753_v20 = vld [vmem:[%s2371_s7 + $0x50] ss:$8 sps:$4 sm:$0xff]   ;;  %v1785_v39 = vld [vmem:[%s2371_s7 + $0xf4] ss:$8 sps:$4 sm:$0xff]   ;;  %v1788_v43 = vld [vmem:[%s2371_s7 + $0x104] ss:$8 sps:$4 sm:$0xff]  }
 0x10b   :  { %826 = vmatpush1.bf16.msra.mxu1 %v1690_v21  ;;  %v1758_v21 = vld [vmem:[%s2371_s7 + $0x64] ss:$8 sps:$4 sm:$0xff]  }
 0x10c   :  { %827 = vmatprep.subr.bf16.mxu1 %v1697_v22  ;;  %v1756_v22 = vld [vmem:[%s2371_s7 + $0x60] ss:$8 sps:$4 sm:$0xff]  }
 0x10f   :  { %828 = vmatpush1.bf16.msra.mxu1 %v1695_v23  ;;  %v1761_v23 = vld [vmem:[%s2371_s7 + $0x74] ss:$8 sps:$4 sm:$0xff]  }
 0x110   :  { %829 = vmatprep.subr.bf16.mxu1 %v1702_v24  ;;  %v1759_v24 = vld [vmem:[%s2371_s7 + $0x70] ss:$8 sps:$4 sm:$0xff]  }
 0x113   :  { %830 = vmatpush1.bf16.msra.mxu1 %v1700_v25  ;;  %v1764_v25 = vld [vmem:[%s2371_s7 + $0x84] ss:$8 sps:$4 sm:$0xff]  }
 0x114   :  { %831 = vmatprep.subr.bf16.mxu1 %v1707_v26  ;;  %v1762_v26 = vld [vmem:[%s2371_s7 + $0x80] ss:$8 sps:$4 sm:$0xff]  }
 0x117   :  { %832 = vmatpush1.bf16.msra.mxu1 %v1705_v27  ;;  %v1767_v27 = vld [vmem:[%s2371_s7 + $0x94] ss:$8 sps:$4 sm:$0xff]  }
 0x118   :  { %833 = vmatprep.subr.bf16.mxu1 %v1712_v28  ;;  %v1765_v28 = vld [vmem:[%s2371_s7 + $0x90] ss:$8 sps:$4 sm:$0xff]  }
 0x11b   :  { %834 = vmatpush1.bf16.msra.mxu1 %v1710_v29  ;;  %v1770_v29 = vld [vmem:[%s2371_s7 + $0xa4] ss:$8 sps:$4 sm:$0xff]  }
 0x11c   :  { %835 = vmatprep.subr.bf16.mxu1 %v1717_v30  ;;  %v1768_v30 = vld [vmem:[%s2371_s7 + $0xa0] ss:$8 sps:$4 sm:$0xff]  }
 0x11f   :  { %836 = vmatpush1.bf16.msra.mxu1 %v1715_v31  ;;  %v1773_v31 = vld [vmem:[%s2371_s7 + $0xb4] ss:$8 sps:$4 sm:$0xff]  }
 0x120   :  { %837 = vmatprep.subr.bf16.mxu1 %v1722_v32  ;;  %v1771_v32 = vld [vmem:[%s2371_s7 + $0xb0] ss:$8 sps:$4 sm:$0xff]  }
 0x123   :  { %838 = vmatpush1.bf16.msra.mxu1 %v1720_v34  ;;  %v1776_v34 = vld [vmem:[%s2371_s7 + $0xc4] ss:$8 sps:$4 sm:$0xff]  }
 0x124   :  { %839 = vmatprep.subr.bf16.mxu1 %v1727_v36  ;;  %v1777_v36 = vld [vmem:[%s2371_s7 + $0xd0] ss:$8 sps:$4 sm:$0xff]  }
 0x127   :  { %840 = vmatpush1.bf16.msra.mxu1 %v1725_v38  ;;  %v1780_v38 = vld [vmem:[%s2371_s7 + $0xe0] ss:$8 sps:$4 sm:$0xff]  }
 0x128   :  { %850 = vmatprep.subr.bf16.mxu1 %v1732_v40  ;;  %v1783_v40 = vld [vmem:[%s2371_s7 + $0xf0] ss:$8 sps:$4 sm:$0xff]  }
 0x1bd   :  { %v375_v48 = vpop.f32.mrb[0].mxu1  ;;  %v416_v49 = vpop.f32.mrb[4].mxu0 }
 0x1be   :  { %v376_v50 = vadd.f32 %v375_v48, %v181_v46  ;;  %v377_v51 = vpop.f32.mrb[1].mxu1  ;;  %v418_v52 = vpop.f32.mrb[5].mxu0  ;;  %v417_v6 = vadd.f32 %v416_v49, %v189_v0  ;;  %v1793_v46 = vld [vmem:[%s2373_s9 + $0x8] sm:$0xff]   ;;  %v1795_v48 = vld [vmem:[%s2373_s9 + $0x18] sm:$0xff]   ;;  %v1796_v49 = vld [vmem:[%s2373_s9 + $0x20] sm:$0xff]  }
 0x1bf   :  { %v378_v53 = vadd.f32 %v377_v51, %v185_v47  ;;  %v379_v54 = vpop.f32.mrb[2].mxu1  ;;  %v419_v55 = vpop.f32.mrb[6].mxu0  ;;  %v1794_v47 = vld [vmem:[%s2373_s9 + $0x10] sm:$0xff]  }
 0x1c0   :  { %v422_v56 = vmax.f32 %v376_v50, 0.0  ;;  %v380_v58 = vpop.f32.mrb[3].mxu1  ;;  %v420_v59 = vpop.f32.mrb[7].mxu0  ;;  %v424_v9 = vmax.f32 %v417_v6, 0.0  ;;  %v1797_v50 = vld [vmem:[%s2373_s9 + $0x28] sm:$0xff]   ;;  %v1798_v51 = vld [vmem:[%s2373_s9 + $0x30] sm:$0xff]  }
 0x1c1   :  { %v423_v60 = vmax.f32 %v378_v53, 0.0  ;;  %v500_v58 = vld [vmem:[%s2370_s6] sm:$0x7] }
 0x1c2   :  { %v425_v63 = vpack.c.bf16 %v422_v56, %v422_v56  ;;  %v427_v14 = vpack.c.bf16 %v424_v9, %v424_v9  ;;  %v505_v59 = vrot.slane %v500_v58, %v2010_v42 }
 0x1c3   :  { %v426_v61 = vpack.c.bf16 %v423_v60, %v423_v60  ;;  %v509_v60 = vrot.slane %v500_v58, %v2016_v44 }
 0x1c5   :  { %841 = vmatprep.mubr.bf16.mxu1 %v426_v61  ;;  %923 = vmatprep.mubr.bf16.mxu0 %v426_v61 }
 0x1c6   :  { %842 = vmatmul.mubr.bf16.vlgmr.msra.gmra.mrb[4].mxu1 %v425_v63  ;;  %924 = vmatmul.mubr.bf16.vlgmr.msra.gmra.mrb[8].mxu0 %v425_v63 }
 0x1c7   :  { %851 = vmatpush1.bf16.msra.mxu1 %v1730_v62  ;;  %882 = vmatprep.mubr.bf16.mxu1 %v1827_v2 }
 0x1c8   :  { %852 = vmatprep.subr.bf16.mxu1 %v1735_v1  ;;  %1209 = vmatpush1.bf16.msra.mxu0 %v1738_v3 }
 0x1c9   :  { %1210 = vmatprep.subr.bf16.mxu0 %v1743_v4 }
 0x1cb   :  { %853 = vmatpush1.bf16.msra.mxu1 %v1733_v5  ;;  %v513_v5 = vrot.slane %v500_v58, %v188_v57  ;;  %v1789_v57 = vld [vmem:[%s2371_s7 + $0x110] ss:$8 sps:$4 sm:$0xff]  }
 0x1cc   :  { %1598 = vmatprep.subr.bf16.mxu1 %v1828_v10  ;;  %1211 = vmatpush1.bf16.msra.mxu0 %v1741_v7 }
 0x1cd   :  { %1212 = vmatprep.subr.bf16.mxu0 %v1746_v8  ;;  %v1786_v8 = vld [vmem:[%s2371_s7 + $0x100] ss:$8 sps:$4 sm:$0xff]  }
 0x1d0   :  { %1213 = vmatpush1.bf16.msra.mxu0 %v1744_v11  ;;  %v1791_v11 = vld [vmem:[%s2371_s7 + $0x114] ss:$8 sps:$4 sm:$0xff]  }
 0x1d1   :  { %1214 = vmatprep.subr.bf16.mxu0 %v1749_v12 }
 0x1d2   :  { %1523 = vmatmul.mubr.msk.bf16.vlgmr.msra.gmra.mrb[4].mxu1 %vm805_vm3, %v427_v14 }
 0x1d3   :  { %1599 = vmatpush3.bf16.msra.mxu1 %v1736_v13  ;;  %1602 = vmatprep.mubr.msk.bf16.mxu1 %vm1829_vm4, %v1828_v10 }
 0x1d4   :  { %1600 = vmatprep.subr.bf16.mxu1 %v1828_v10  ;;  %1215 = vmatpush1.bf16.msra.mxu0 %v1747_v15 }
 0x1d5   :  { %1216 = vmatprep.subr.bf16.mxu0 %v1752_v16 }
 0x1d7   :  { %1601 = vmatpush3.bf16.msra.mxu1 %v1737_v17 }
 0x1d8   :  { %1217 = vmatpush1.bf16.msra.mxu0 %v1750_v18  ;;  %1376 = vmatprep.subr.bf16.mxu1 %v1827_v2  ;;  %v1799_v18 = vld [vmem:[%s2373_s9 + $0x38] sm:$0xff]  }
 0x1d9   :  { %1218 = vmatprep.subr.bf16.mxu0 %v1755_v19  ;;  %v1800_v19 = vld [vmem:[%s2373_s9 + $0x40] sm:$0xff]  }
 0x1da   :  { %1603 = vmatmul.mubr.msk.bf16.vlgmr.msra.gmra.mrb[8].mxu1 %vm805_vm3, %v427_v14 }
 0x1db   :  { %1377 = vmatpush1.bf16.msra.mxu1 %v1792_v45 }
 0x1dc   :  { %1219 = vmatpush1.bf16.msra.mxu0 %v1753_v20  ;;  %1378 = vmatprep.subr.bf16.mxu1 %v1827_v2  ;;  %v1013_v20 = vld [vmem:[%s2372_s8] sm:$0x3]  ;;  %s1830_s8 = smov [#allocation2]  }
 0x1dd   :  { %1220 = vmatprep.subr.bf16.mxu0 %v1758_v21  ;;  %v1018_v21 = vrot.slane %v1013_v20, %v2010_v42  ;;  %s1424_s12 = sshll.u32 %s1830_s8, 4  ;;  %s1425_s12 = int_to_ptr.vmem [resolvable:$true] %s1424_s12 }
 0x1de   :  { %s1803_s13 = scalar_lea.vmem %s1425_s12, 128  ;;  %p1808_p1 = scmp.lt.s32.totalorder %s1425_s12, %s1425_s12 }
 0x1df   :  { %1379 = vmatpush1.bf16.msra.mxu1 %v1793_v46  ;;  %p1804_p0 = scmp.ne.s32.totalorder %s1425_s12, %s1803_s13  ;;  %p1809_p2 = scmp.lt.s32.totalorder %s1803_s13, %s1803_s13 }
 0x1e0   :  { %1221 = vmatpush1.bf16.msra.mxu0 %v1756_v22  ;;  %1380 = vmatprep.subr.bf16.mxu1 %v1827_v2  ;;  %v1022_v22 = vrot.slane %v1013_v20, %v2016_v44 }
 0x1e1   :  { %1222 = vmatprep.subr.bf16.mxu0 %v1761_v23  ;;  %p1810_p3 = por %p1809_p2, %p1808_p1 }
 0x1e3   :  { %1381 = vmatpush1.bf16.msra.mxu1 %v1794_v47  ;;  %p1811_p4 = pnand %p1810_p3, %p1804_p0 }
 0x1e4   :  { %1223 = vmatpush1.bf16.msra.mxu0 %v1759_v24  ;;  %1382 = vmatprep.subr.bf16.mxu1 %v1827_v2 }
 0x1e5   :  { %1224 = vmatprep.subr.bf16.mxu0 %v1764_v25 }
 0x1e7   :  { %1383 = vmatpush1.bf16.msra.mxu1 %v1795_v48 }
 0x1e8   :  { %1225 = vmatpush1.bf16.msra.mxu0 %v1762_v26  ;;  %1384 = vmatprep.subr.bf16.mxu1 %v1827_v2 }
 0x1e9   :  { %1226 = vmatprep.subr.bf16.mxu0 %v1767_v27 }
 0x1eb   :  { %1385 = vmatpush1.bf16.msra.mxu1 %v1796_v49 }
 0x1ec   :  { %1227 = vmatpush1.bf16.msra.mxu0 %v1765_v28  ;;  %1386 = vmatprep.subr.bf16.mxu1 %v1827_v2 }
 0x1ed   :  { %1228 = vmatprep.subr.bf16.mxu0 %v1770_v29 }
 0x1ef   :  { %1387 = vmatpush1.bf16.msra.mxu1 %v1797_v50 }
 0x1f0   :  { %1229 = vmatpush1.bf16.msra.mxu0 %v1768_v30  ;;  %1388 = vmatprep.subr.bf16.mxu1 %v1827_v2 }
 0x1f1   :  { %1230 = vmatprep.subr.bf16.mxu0 %v1773_v31 }
 0x1f3   :  { %1389 = vmatpush1.bf16.msra.mxu1 %v1798_v51 }
 0x1f4   :  { %1231 = vmatpush1.bf16.msra.mxu0 %v1771_v32  ;;  %1390 = vmatprep.subr.bf16.mxu1 %v1827_v2  ;;  %v1562_v32 = vld [vmem:[%s2374_s10] ss:$0 sm:$0xff] }
 0x1f5   :  { %1232 = vmatprep.subr.bf16.mxu0 %v1776_v34 }
 0x1f7   :  { %1391 = vmatpush1.bf16.msra.mxu1 %v1799_v18 }
 0x1f8   :  { %1233 = vmatpush1.bf16.msra.mxu0 %v1774_v33  ;;  %1392 = vmatprep.subr.bf16.mxu1 %v1827_v2 }
 0x1f9   :  { %1234 = vmatprep.subr.bf16.mxu0 %v1779_v35 }
 0x1fb   :  { %1393 = vmatpush1.bf16.msra.mxu1 %v1800_v19 }
 0x1fc   :  { %1235 = vmatpush1.bf16.msra.mxu0 %v1777_v36 }
 0x1fd   :  { %1236 = vmatprep.subr.bf16.mxu0 %v1782_v37 }
 0x200   :  { %1237 = vmatpush1.bf16.msra.mxu0 %v1780_v38 }
 0x201   :  { %1238 = vmatprep.subr.bf16.mxu0 %v1785_v39 }
 0x204   :  { %1239 = vmatpush1.bf16.msra.mxu0 %v1783_v40 }
 0x205   :  { %1249 = vmatprep.subr.bf16.mxu0 %v1788_v43 }
 0x299   :  { %v1589_v52 = vpop.f32.mrb[8].mxu0 }
 0x29a   :  { %v1590_v53 = vpop.f32.mrb[9].mxu0 }
 0x29b   :  { %v1591_v54 = vadd.f32 %v1590_v53, %v1589_v52  ;;  %v1592_v55 = vpop.f32.mrb[10].mxu0 }
 0x29c   :  { %v1593_v56 = vpop.f32.mrb[11].mxu0 }
 0x29d   :  { %v926_v10 = vadd.f32 %v1591_v54, %v513_v5 }
 0x2a5   :  { %v884_v61 = vpop.f32.mrb[4].mxu1 }
 0x2a6   :  { %v1606_v62 = vadd.f32 %v884_v61, %v505_v59  ;;  %v886_v63 = vpop.f32.mrb[5].mxu1 }
 0x2a7   :  { %v1607_v0 = vadd.f32 %v886_v63, %v509_v60  ;;  %v888_v1 = vpop.f32.mrb[6].mxu1 }
 0x2a8   :  { %v971_v3 = vmax.f32 %v1606_v62, 0.0  ;;  %v889_v4 = vpop.f32.mrb[7].mxu1 }
 0x2a9   :  { %v972_v6 = vmax.f32 %v1607_v0, 0.0 }
 0x2aa   :  { %v974_v9 = vpack.c.bf16 %v971_v3, %v971_v3 }
 0x2ab   :  { %v975_v7 = vpack.c.bf16 %v972_v6, %v972_v6 }
 0x2ad   :  { %v965_v12 = vpop.f32.mrb[8].mxu1  ;;  %1240 = vmatprep.mubr.bf16.mxu0 %v975_v7 }
 0x2ae   :  { %v966_v13 = vadd.f32 %v965_v12, %v926_v10  ;;  %v1604_v14 = vpop.f32.mrb[9].mxu1  ;;  %1241 = vmatmul.mubr.bf16.vlgmr.msra.gmra.mrb[12].mxu0 %v974_v9 }
 0x2af   :  { %1250 = vmatpush1.bf16.msra.mxu0 %v1786_v8  ;;  %v968_v41 = vpop.f32.mrb[10].mxu1  ;;  %1281 = vmatprep.mubr.bf16.mxu0 %v1827_v2 }
 0x2b0   :  { %v1605_v15 = vpop.f32.mrb[11].mxu1  ;;  %1251 = vmatprep.subr.bf16.mxu0 %v1791_v11  ;;  %v973_v16 = vmax.f32 %v966_v13, 0.0 }
 0x2b2   :  { %v976_v17 = vpack.c.bf16 %v973_v16, %v973_v16 }
 0x2b3   :  { %1252 = vmatpush1.bf16.msra.mxu0 %v1789_v57 }
 0x2ba   :  { %1561 = vmatmul.mubr.msk.bf16.vlgmr.msra.gmra.mrb[12].mxu0 %vm805_vm3, %v976_v17 }
 0x38d   :  { %v1283_v23 = vpop.f32.mrb[12].mxu0 }
 0x38e   :  { %v1608_v24 = vadd.f32 %v1283_v23, %v1018_v21  ;;  %v1285_v25 = vpop.f32.mrb[13].mxu0 }
 0x38f   :  { %v1609_v26 = vadd.f32 %v1285_v25, %v1022_v22  ;;  %v1287_v27 = vpop.f32.mrb[14].mxu0 }
 0x390   :  { %v1290_v28 = vmax.f32 %v1608_v24, 0.0  ;;  %v1288_v2 = vpop.f32.mrb[15].mxu0 }
 0x391   :  { %v1291_v29 = vmax.f32 %v1609_v26, 0.0 }
 0x392   :  { %v1292_v31 = vpack.c.bf16 %v1290_v28, %v1290_v28 }
 0x393   :  { %v1293_v30 = vpack.c.bf16 %v1291_v29, %v1291_v29 }
 0x395   :  { %1572 = vmatprep.mubr.msk.bf16.mxu1 %vm337_vm2, %v1293_v30 }
 0x396   :  { %1409 = vmatmul.mubr.bf16.vlgmr.msra.gmra.mrb[12].mxu1 %v1292_v31 }
 0x469   :  { %v1410_v42 = vpop.f32.mrb[12].mxu1 }
 0x46a   :  { %v1411_v33 = vadd.f32 %v1562_v32, %v1410_v42  ;;  %v1412_v44 = vpop.f32.mrb[13].mxu1 }
 0x46b   :  { %v1413_v34 = vpop.f32.mrb[14].mxu1 }
 0x46c   :  { %1801 = vtanh.f32 %v1411_v33  ;;  %v1414_v35 = vpop.f32.mrb[15].mxu1 }
 0x476   :  { %v1802_v36 = vpop.eup %1801 }
 0x477   :  { %1417 = vst.msk [vmem:[#allocation2] sm:$0xff] %vm84_vm1, %v1802_v36 }
 0x478   :  { %1814 = shalt.err (!%p1811_p4)
}
 0x479   :  { %s1815_s15 = scalar_lea.hbm %s2375_s11, 128 }
 0x47a   :  { %p1816_p5 = scmp.ne.s32.totalorder %s2375_s11, %s1815_s15  ;;  %p1819_p6 = scmp.lt.u32.totalorder %s1815_s15, %s2375_s11 }
 0x47c   :  { %p1821_p7 = pnand %p1819_p6, %p1816_p5 }
 0x47e   :  { %1824 = shalt.err (!%p1821_p7)
}
 0x47f   :  { %1427 = dma.vmem_to_hbm [thread:$0]  %s1425_s12, 128, %s2375_s11, [#allocation3]  }
 0x480   :  { %1825 = dma.done.wait [#allocation3], 128  }
 0x481   :  { %1826 = vsyncadd [#allocation3], 4294967168 }
 0x482   :  { %1431 = vsyncpa [#allocation3], 1 }

</bundles_post_ra>
